<compile_context>
chip_gen: v7x
topology: tpu7x:2x2x1
jax: 0.10.0
libtpu: 0.0.40
codegen_flags: <defaults>
</compile_context>

<pallas_src>
import jax
import jax.numpy as jnp
from jax.experimental import pallas as pl
from jax.experimental.pallas import tpu as pltpu


def _cdiv(a, b):
    return -(-a // b)


def _sublane_multiple(dtype):
    size = jnp.dtype(dtype).itemsize
    if size >= 4:
        return 8
    if size == 2:
        return 16
    return 32


def _choose_tile_rows(n_rows, bytes_per_row, sublane):
    """Row-tile size: ~4 MiB per input per tile, sublane-aligned, and an even
    tile count (>= 2 when possible) so v7x's two TensorCores get a balanced
    share of the 'parallel' grid axis.  Free on single-TC v5e/v6e."""
    target_tile_bytes = 4 * 1024 * 1024   # per input per tile
    max_tile_rows = 8192                  # raised cap (was 1024)

    tr = target_tile_bytes // max(1, bytes_per_row)
    tr = max(sublane, min(tr, max_tile_rows))
    tr = (tr // sublane) * sublane
    tr = min(tr, n_rows)
    if tr <= 0:
        return max(1, n_rows)

    nt = _cdiv(n_rows, tr)
    if nt == 1:
        # Split a single tile in two so both v7x TCs get work.
        if n_rows > sublane:
            tr2 = min(_cdiv(_cdiv(n_rows, 2), sublane) * sublane, n_rows)
            if tr2 > 0 and _cdiv(n_rows, tr2) >= 2:
                return tr2
        return tr
    if nt % 2 == 1:
        # Shrink tiles slightly to reach an even tile count (2:1 -> balanced).
        tr2 = max(sublane, _cdiv(_cdiv(n_rows, nt + 1), sublane) * sublane)
        if _cdiv(n_rows, tr2) % 2 == 0:
            return tr2
    return tr


def _make_joints_mse_kernel(total_rows, tile_rows, num_tiles, use_weight):
    """Kernel specialized on (static) row count / tile size / tile count / weighting."""
    rows_in_last = total_rows - (num_tiles - 1) * tile_rows
    needs_mask = rows_in_last != tile_rows

    def kernel(*refs):
        if use_weight:
            pred_ref, gt_ref, w_ref, out_ref = refs
        else:
            pred_ref, gt_ref, out_ref = refs
            w_ref = None

        p = pred_ref[...].astype(jnp.float32)          # (TR, P)
        g = gt_ref[...].astype(jnp.float32)            # (TR, P)
        d = p - g
        # Lane-reduce first, then weight: (w*p - w*g)^2 == w^2 * (p - g)^2 and
        # w is constant across P, so this avoids the (TR,1)->(TR,P) broadcast.
        rowsum = jnp.sum(d * d, axis=-1, keepdims=True)   # (TR, 1)
        if use_weight:
            w = w_ref[...].astype(jnp.float32)             # (TR, 1)
            contrib = rowsum * (w * w)
        else:
            contrib = rowsum

        # Per-tile partial sum, broadcast across 128 lanes -> unmasked,
        # lane-dense store.
        out_ref[...] = jnp.full((1, 1, 128), jnp.sum(contrib), dtype=jnp.float32)

        if needs_mask:
            # Only the final (partial) tile pays for masking; the select
            # (jnp.where) keeps garbage/NaN in padded rows from leaking in,
            # and this path fully overwrites out_ref.
            @pl.when(pl.program_id(0) == num_tiles - 1)
            def _():
                row = jax.lax.broadcasted_iota(jnp.int32, (tile_rows, 1), 0)
                masked = jnp.where(row < rows_in_last, contrib, jnp.float32(0.0))
                out_ref[...] = jnp.full((1, 1, 128), jnp.sum(masked),
                                        dtype=jnp.float32)

    return kernel


def joints_mse_loss(output, target, target_weight=None, use_target_weight=True):
    """Pallas implementation of JointsMSELoss.forward (returns a scalar f32)."""
    B, J = output.shape[0], output.shape[1]
    P = 1
    for s in output.shape[2:]:
        P *= s
    N = B * J

    # Free reshapes: contiguity-preserving, no extra HBM pass.
    pred = output.reshape(N, P)
    gt = target.reshape(N, P)

    sub = _sublane_multiple(output.dtype)
    if use_target_weight:
        sub = max(sub, _sublane_multiple(target_weight.dtype))
    itemsize = output.dtype.itemsize
    bytes_per_row = max(1, P * itemsize)

    tr = _choose_tile_rows(N, bytes_per_row, sub)
    num_tiles = _cdiv(N, tr)

    in_specs = [
        pl.BlockSpec((tr, P), lambda i: (i, 0)),
        pl.BlockSpec((tr, P), lambda i: (i, 0)),
    ]
    args = [pred, gt]
    bytes_accessed = 2 * N * P * itemsize
    if use_target_weight:
        w = target_weight.reshape(N, 1)
        in_specs.append(pl.BlockSpec((tr, 1), lambda i: (i, 0)))
        args.append(w)
        bytes_accessed += N * w.dtype.itemsize
    bytes_accessed += num_tiles * 128 * 4  # partial-sum output

    kernel = _make_joints_mse_kernel(N, tr, num_tiles, use_target_weight)

    partials = pl.pallas_call(
        kernel,
        out_shape=jax.ShapeDtypeStruct((num_tiles, 1, 128), jnp.float32),
        grid=(num_tiles,),
        in_specs=in_specs,
        out_specs=pl.BlockSpec((1, 1, 128), lambda i: (i, 0, 0)),
        compiler_params=pltpu.CompilerParams(
            dimension_semantics=("parallel",),
            vmem_limit_bytes=32 * 1024 * 1024,
        ),
        cost_estimate=pl.CostEstimate(
            flops=3 * N * P,
            transcendentals=0,
            bytes_accessed=bytes_accessed,
        ),
    )(*args)

    # final_loss = (1/J) * sum_j 0.5 * mean_{B,P}(weighted sq diff)
    #            = 0.5 * sum_all / (J * B * P)
    denom = jnp.float32(J) * jnp.float32(B) * jnp.float32(P)
    return 0.5 * jnp.sum(partials[:, 0, 0]) / denom


def _reference_loss(output, target, target_weight, use_target_weight=True):
    """Pure-JAX reference mirroring the PyTorch forward exactly."""
    B, J = output.shape[0], output.shape[1]
    pred = output.reshape(B, J, -1).astype(jnp.float32)
    gt = target.reshape(B, J, -1).astype(jnp.float32)
    loss = jnp.float32(0.0)
    for j in range(J):
        hp = pred[:, j, :]
        hg = gt[:, j, :]
        if use_target_weight:
            wj = target_weight[:, j].astype(jnp.float32)   # (B, 1)
            hp = hp * wj
            hg = hg * wj
        loss = loss + 0.5 * jnp.mean((hp - hg) ** 2)
    return loss / J


if __name__ == "__main__":
    key = jax.random.PRNGKey(0)
    k1, k2, k3 = jax.random.split(key, 3)

    B, J, H, W = 2, 4, 16, 16
    output = jax.random.normal(k1, (B, J, H, W), dtype=jnp.float32)
    target = jax.random.normal(k2, (B, J, H, W), dtype=jnp.float32)
    target_weight = jax.random.uniform(k3, (B, J, 1), dtype=jnp.float32)

    # Weighted path.
    loss_w = joints_mse_loss(output, target, target_weight, use_target_weight=True)
    loss_w = jax.block_until_ready(loss_w)
    ref_w = _reference_loss(output, target, target_weight, use_target_weight=True)
    assert jnp.allclose(loss_w, ref_w, rtol=1e-5, atol=1e-6), (loss_w, ref_w)

    # Unweighted path (specialized: no weight tensor DMA'd).
    loss_u = joints_mse_loss(output, target, None, use_target_weight=False)
    loss_u = jax.block_until_ready(loss_u)
    ref_u = _reference_loss(output, target, target_weight, use_target_weight=False)
    assert jnp.allclose(loss_u, ref_u, rtol=1e-5, atol=1e-6), (loss_u, ref_u)

    print("KERNEL_OK")
</pallas_src>

<mosaic_0001>
module attributes {stable_mosaic.version = 11 : i64} {
  func.func @kernel(%arg0: i32, %arg1: memref<8x256xf32, #tpu.memory_space<vmem>>, %arg2: memref<8x256xf32, #tpu.memory_space<vmem>>, %arg3: memref<8x1xf32, #tpu.memory_space<vmem>>, %arg4: memref<1x1x128xf32, #tpu.memory_space<vmem>>) attributes {dimension_semantics = [#tpu.dimension_semantics<parallel>], iteration_bounds = array<i64: 1>, scalar_prefetch = 0 : i64, scratch_operands = 0 : i64, tpu.core_type = #tpu.core_type<tc>, window_params = [{transform_indices = @transform_0, window_bounds = array<i64: 8, 256>}, {transform_indices = @transform_1, window_bounds = array<i64: 8, 256>}, {transform_indices = @transform_2, window_bounds = array<i64: 8, 1>}, {transform_indices = @transform_3, window_bounds = array<i64: 1, 1, 128>}]} {
    %c0 = arith.constant 0 : index
    %c0_0 = arith.constant 0 : index
    %0 = vector.load %arg1[%c0, %c0_0] : memref<8x256xf32, #tpu.memory_space<vmem>>, vector<8x256xf32>
    %c0_1 = arith.constant 0 : index
    %c0_2 = arith.constant 0 : index
    %1 = vector.load %arg2[%c0_1, %c0_2] : memref<8x256xf32, #tpu.memory_space<vmem>>, vector<8x256xf32>
    %2 = arith.subf %0, %1 : vector<8x256xf32>
    %3 = arith.mulf %2, %2 : vector<8x256xf32>
    %cst = arith.constant dense<0.000000e+00> : vector<8xf32>
    %4 = vector.multi_reduction <add>, %3, %cst [1] : vector<8x256xf32> to vector<8xf32>
    %5 = vector.shape_cast %4 : vector<8xf32> to vector<8x1xf32>
    %c0_3 = arith.constant 0 : index
    %c0_4 = arith.constant 0 : index
    %6 = vector.load %arg3[%c0_3, %c0_4] : memref<8x1xf32, #tpu.memory_space<vmem>>, vector<8x1xf32>
    %7 = arith.mulf %6, %6 : vector<8x1xf32>
    %8 = arith.mulf %5, %7 : vector<8x1xf32>
    %9 = vector.shape_cast %8 : vector<8x1xf32> to vector<1x8x1xf32>
    %cst_5 = arith.constant dense<0.000000e+00> : vector<1xf32>
    %10 = vector.multi_reduction <add>, %9, %cst_5 [1, 2] : vector<1x8x1xf32> to vector<1xf32>
    %11 = vector.shape_cast %10 : vector<1xf32> to vector<1x1x1xf32>
    %12 = vector.extract %11[0, 0, 0] : f32 from vector<1x1x1xf32>
    %13 = vector.broadcast %12 : f32 to vector<1x1x128xf32>
    %c0_6 = arith.constant 0 : index
    %c0_7 = arith.constant 0 : index
    %c0_8 = arith.constant 0 : index
    %14 = vector.load %arg4[%c0_6, %c0_7, %c0_8] : memref<1x1x128xf32, #tpu.memory_space<vmem>>, vector<1x1x128xf32>
    tpu.vector_store %arg4[%c0_6, %c0_7, %c0_8], %13 {strides = array<i32>} : memref<1x1x128xf32, #tpu.memory_space<vmem>>, vector<1x1x128xf32>,
    return
  }
  func.func @transform_0(%arg0: i32) -> (i32, i32) {
    %c0_i32 = arith.constant 0 : i32
    %c0_i32_0 = arith.constant 0 : i32
    return %arg0, %c0_i32 : i32, i32
  }
  func.func @transform_1(%arg0: i32) -> (i32, i32) {
    %c0_i32 = arith.constant 0 : i32
    %c0_i32_0 = arith.constant 0 : i32
    return %arg0, %c0_i32 : i32, i32
  }
  func.func @transform_2(%arg0: i32) -> (i32, i32) {
    %c0_i32 = arith.constant 0 : i32
    %c0_i32_0 = arith.constant 0 : i32
    return %arg0, %c0_i32 : i32, i32
  }
  func.func @transform_3(%arg0: i32) -> (i32, i32, i32) {
    %c0_i32 = arith.constant 0 : i32
    %c0_i32_0 = arith.constant 0 : i32
    %c0_i32_1 = arith.constant 0 : i32
    return %arg0, %c0_i32, %c0_i32_0 : i32, i32, i32
  }
}

</mosaic_0001>

<bundles_post_ra>
// kernel: tpu_custom_call.1
= control target key start
LH: loop header
LB: loop body
LE: loop exit
PB: predicated region body
PF: predicated region fallthrough
CT: control target
= control target key end

     0   :  { %8 = vsyncpa [#allocation3], 0  ;;  %s221_s0 = inlined_call_operand.hbm [shape: f32[8,256], index: 0, kind: input, shape index: {}]   ;;  %s222_s1 = inlined_call_operand.hbm [shape: f32[8,256], index: 1, kind: input, shape index: {}]   ;;  %s223_s2 = inlined_call_operand.vmem [shape: f32[8,1], index: 2, kind: input, shape index: {}]   ;;  %s224_s3 = inlined_call_operand.hbm [shape: f32[1,1,128], index: 3, kind: output, shape index: {}]  }
   0x1   :  { %9 = vsyncpa [#allocation6], 0 }
   0x2   :  { %10 = vsyncpa [#allocation4], 0  ;;  %s159_s12 = smov [#allocation2]   ;;  %s160_s14 = smov [#allocation5]  }
   0x3   :  { %s17_s13 = sshll.u32 %s159_s12, 4  ;;  %s27_s15 = sshll.u32 %s160_s14, 4  ;;  %s18_s13 = int_to_ptr.vmem [resolvable:$true] %s17_s13  ;;  %s28_s15 = int_to_ptr.vmem [resolvable:$true] %s27_s15 }
   0x4   :  { %s87_s18 = scalar_lea.hbm %s221_s0, 256 }
   0x5   :  { %p88_p0 = scmp.ne.s32.totalorder %s221_s0, %s87_s18  ;;  %p91_p1 = scmp.lt.u32.totalorder %s87_s18, %s221_s0 }
   0x7   :  { %p93_p2 = pnand %p91_p1, %p88_p0 }
   0x9   :  { %96 = shalt.err (!%p93_p2)
}
   0xa   :  { %s97_s23 = scalar_lea.vmem %s18_s13, 256  ;;  %p102_p4 = scmp.lt.s32.totalorder %s18_s13, %s18_s13 }
   0xb   :  { %p98_p3 = scmp.ne.s32.totalorder %s18_s13, %s97_s23  ;;  %p103_p5 = scmp.lt.s32.totalorder %s97_s23, %s97_s23 }
   0xd   :  { %p104_p6 = por %p103_p5, %p102_p4 }
   0xf   :  { %p105_p7 = pnand %p104_p6, %p98_p3 }
  0x11   :  { %108 = shalt.err (!%p105_p7)
}
  0x12   :  { %20 = dma.hbm_to_vmem [thread:$0]  %s221_s0, 256, %s18_s13, [#allocation3]  }
  0x13   :  { %s109_s28 = scalar_lea.hbm %s222_s1, 256 }
  0x14   :  { %p110_p8 = scmp.ne.s32.totalorder %s222_s1, %s109_s28  ;;  %p113_p9 = scmp.lt.u32.totalorder %s109_s28, %s222_s1 }
  0x16   :  { %p115_p10 = pnand %p113_p9, %p110_p8 }
  0x18   :  { %118 = shalt.err (!%p115_p10)
}
  0x19   :  { %s119_s6 = scalar_lea.vmem %s28_s15, 256  ;;  %p124_p12 = scmp.lt.s32.totalorder %s28_s15, %s28_s15 }
  0x1a   :  { %p120_p11 = scmp.ne.s32.totalorder %s28_s15, %s119_s6  ;;  %p125_p13 = scmp.lt.s32.totalorder %s119_s6, %s119_s6 }
  0x1c   :  { %p126_p0 = por %p125_p13, %p124_p12 }
  0x1e   :  { %p127_p1 = pnand %p126_p0, %p120_p11 }
  0x20   :  { %130 = shalt.err (!%p127_p1)
}
  0x21   :  { %30 = dma.hbm_to_vmem [thread:$0]  %s222_s1, 256, %s28_s15, [#allocation6]  }
  0x22   :  { %153 = dma.done.wait [#allocation3], 256  }
  0x23   :  { %154 = vsyncadd [#allocation3], 4294967040 }
  0x24   :  { %155 = dma.done.wait [#allocation6], 256  }
  0x25   :  { %156 = vsyncadd [#allocation6], 4294967040  ;;  %v39_v0 = vld [vmem:[#allocation2] sm:$0xff]  ;;  %v40_v1 = vld [vmem:[#allocation2 + $0x8] sm:$0xff]  ;;  %vm53_vm0 = vcmask 7168   ;;  %s161_s1 = smov [#allocation7]  }
  0x26   :  { %v41_v2 = vld [vmem:[#allocation5] sm:$0xff]  ;;  %v42_v3 = vld [vmem:[#allocation5 + $0x8] sm:$0xff]  ;;  %v50_v9 = vld [vmem:[%s223_s2] sm:$0xff]  ;;  %s72_s10 = sshll.u32 %s161_s1, 4  ;;  %s73_s10 = int_to_ptr.vmem [resolvable:$true] %s72_s10 }
  0x27   :  { %v43_v4 = vsub.f32 %v39_v0, %v41_v2  ;;  %v44_v5 = vsub.f32 %v40_v1, %v42_v3  ;;  %v51_v10 = vmul.f32 %v50_v9, %v50_v9  ;;  %s131_s2 = scalar_lea.vmem %s73_s10, 16  ;;  %s135_s12 = scalar_lea.vmem %s73_s10, 32 }
  0x28   :  { %p132_p2 = scmp.ne.s32.totalorder %s73_s10, %s131_s2  ;;  %p136_p3 = scmp.lt.s32.totalorder %s73_s10, %s73_s10 }
  0x29   :  { %v45_v6 = vmul.f32 %v43_v4, %v43_v4  ;;  %v46_v7 = vmul.f32 %v44_v5, %v44_v5  ;;  %p137_p4 = scmp.lt.s32.totalorder %s135_s12, %s131_s2 }
  0x2b   :  { %v47_v8 = vadd.f32 %v46_v7, %v45_v6  ;;  %p138_p5 = por %p137_p4, %p136_p3 }
  0x2d   :  { %48 = vadd.xlane.f32.xlu0 %v47_v8  ;;  %p139_p6 = pnand %p138_p5, %p132_p2 }
  0xba   :  { %v49_v11 = vpop.xlane.xlu0 %48 }
  0xbb   :  { %v52_v12 = vmul.f32 %v51_v10, %v49_v11 }
  0xbd   :  { %v54_v13 = vsel %vm53_vm0, %v52_v12, 0.0 }
  0xbe   :  { %55 = vadd.xlane.f32.xlu0 %v54_v13 }
 0x14b   :  { %v56_v14 = vpop.xlane.xlu0 %55 }
 0x14c   :  { %v57_v15 = vrot.slane %v56_v14, 4 }
 0x14e   :  { %v58_v16 = vadd.f32 %v57_v15, %v56_v14 }
 0x150   :  { %v59_v17 = vrot.slane %v58_v16, 2 }
 0x152   :  { %v60_v18 = vadd.f32 %v59_v17, %v58_v16 }
 0x154   :  { %v61_v19 = vrot.slane %v60_v18, 1 }
 0x156   :  { %v62_v20 = vadd.f32 %v61_v19, %v60_v18 }
 0x158   :  { %82 = vpush %v62_v20 }
 0x189   :  { %s83_s11 = spop %82 }
 0x18a   :  { %v64_v21 = vstv %s83_s11 }
 0x18b   :  { %65 = vst [vmem:[#allocation7] sm:$0x1] %v64_v21 }
 0x18c   :  { %142 = shalt.err (!%p139_p6)
}
 0x18d   :  { %s143_s15 = scalar_lea.hbm %s224_s3, 16 }
 0x18e   :  { %p144_p7 = scmp.ne.s32.totalorder %s224_s3, %s143_s15  ;;  %p147_p8 = scmp.lt.u32.totalorder %s143_s15, %s224_s3 }
 0x190   :  { %p149_p9 = pnand %p147_p8, %p144_p7 }
 0x192   :  { %152 = shalt.err (!%p149_p9)
}
 0x193   :  { %75 = dma.vmem_to_hbm [thread:$0]  %s73_s10, 16, %s224_s3, [#allocation4]  }
 0x194   :  { %157 = dma.done.wait [#allocation4], 16  }
 0x195   :  { %158 = vsyncadd [#allocation4], 4294967280 }
 0x196   :  { %79 = vsyncpa [#allocation3], 1 }
 0x197   :  { %80 = vsyncpa [#allocation6], 1 }
 0x198   :  { %81 = vsyncpa [#allocation4], 1 }

</bundles_post_ra>
